<compile_context>
chip_gen: v7x
topology: tpu7x:2x2x1
jax: 0.10.0
libtpu: 0.0.40
codegen_flags: <defaults>
</compile_context>

<pallas_src>
import numpy as np
import jax
import jax.numpy as jnp
from jax.experimental import pallas as pl
from jax.experimental.pallas import tpu as pltpu

PAD_ID = 0
NUM_PADDING_AT_BEGINNING = 0


# ----------------------------- kernel 1: v_head -----------------------------
def _v_head_kernel(h_ref, w_ref, o_ref):
    # h_ref: (TILE_B, S, H) in the model's native dtype; w_ref: (1, H) f32.
    # Matrix-vector product is HBM-bound, so a VPU multiply + lane reduce is at the
    # roofline; accumulate in f32, store lane-dense (TILE_B, S).
    h = h_ref[...].astype(jnp.float32)
    w = w_ref[...].astype(jnp.float32)            # (1, H)
    o_ref[...] = jnp.sum(h * w[:, None, :], axis=-1)


def _pick_tile_b(total_b, S, H, itemsize, budget_bytes=8 * 1024 * 1024):
    # ~8 MiB per input buffer -> 2x double-buffered + output stays well under the
    # 48 MiB scoped-VMEM limit we request (safe on v7x's 64 MiB; v5e/v6e have slack
    # to go larger).  TODO(synk): also tile the sequence axis if a single batch row
    # (S*H*itemsize) ever exceeds the budget.
    row_bytes = max(1, S * H * itemsize)
    tile = max(1, min(total_b, budget_bytes // row_bytes))
    while total_b % tile:
        tile -= 1
    return int(tile)


# ------------------- kernel 2: pairwise ranking loss / scores ----------------
def _make_loss_kernel(bs, bs_pad, seq_len, pad_id, num_pad_begin):
    S = seq_len
    k = num_pad_begin

    def kernel(ids_c_ref, ids_r_ref, rew_c_ref, rew_r_ref,
               loss_ref, cs_ref, rs_ref):
        ids_c = ids_c_ref[...]            # (bs_pad, S) int32
        ids_r = ids_r_ref[...]            # (bs_pad, S) int32
        rew_c = rew_c_ref[...]            # (bs_pad, S) f32
        rew_r = rew_r_ref[...]            # (bs_pad, S) f32

        pos = jax.lax.broadcasted_iota(jnp.int32, (bs_pad, S), 1)
        pos_f = pos.astype(jnp.float32)
        big = jnp.float32(S)

        def kth_pad_index(ids):
            # Index of the k-th PAD token (k static & small), or S if fewer than
            # k+1 pads.  k+1 masked min-reductions; no S x S intermediates.
            is_pad = ids == pad_id
            prev = jnp.full((bs_pad, 1), -1.0, jnp.float32)
            for _ in range(k + 1):
                cand = jnp.where(is_pad & (pos_f > prev), pos_f, big)
                prev = jnp.min(cand, axis=1, keepdims=True)
            return prev.astype(jnp.int32)                      # (bs_pad, 1)

        c_ind = kth_pad_index(ids_c)                           # (bs_pad, 1)
        r_ind_pad = kth_pad_index(ids_r)                       # (bs_pad, 1)

        diverge = ids_c != ids_r
        has_div = jnp.max(diverge.astype(jnp.float32), axis=1, keepdims=True) > 0.0
        div_first = jnp.min(jnp.where(diverge, pos_f, big),
                            axis=1, keepdims=True).astype(jnp.int32)

        r_ind = jnp.where(has_div, r_ind_pad, c_ind)
        end_ind = jnp.where(has_div, jnp.maximum(c_ind, r_ind_pad),
                            jnp.full_like(c_ind, S))
        div_ind = jnp.where(has_div, div_first, jnp.full_like(c_ind, S - 1))

        # truncated-window pairwise loss: -mean(logsigmoid(c - r)) over [div, end)
        mask = ((pos >= div_ind) & (pos < end_ind)).astype(jnp.float32)
        diff = rew_c - rew_r
        logsig = jnp.minimum(diff, 0.0) - jnp.log(1.0 + jnp.exp(-jnp.abs(diff)))
        # TODO(synk): empty [div, end) windows are clamped to count=1 (loss 0) here,
        # while the PyTorch reference would produce NaN from an empty mean.
        cnt = jnp.maximum(jnp.sum(mask, axis=1, keepdims=True), 1.0)
        per_pair = -jnp.sum(logsig * mask, axis=1, keepdims=True) / cnt   # (bs_pad,1)

        # end-token scores: reward[ind - 1], with the PyTorch negative-index wrap
        # (ind == 0 -> last token) guarded explicitly.
        c_sel = jnp.where(c_ind > 0, c_ind - 1, S - 1)
        r_sel = jnp.where(r_ind > 0, r_ind - 1, S - 1)
        cs = jnp.sum(jnp.where(pos == c_sel, rew_c, 0.0), axis=1, keepdims=True)
        rs = jnp.sum(jnp.where(pos == r_sel, rew_r, 0.0), axis=1, keepdims=True)

        # Only the first `bs` rows are real; padded rows are masked out of the loss.
        row = jax.lax.broadcasted_iota(jnp.int32, (bs_pad, 1), 0)
        valid = (row < bs).astype(jnp.float32)
        loss_ref[...] = jnp.sum(per_pair * valid, axis=0, keepdims=True) / bs  # (1,1)
        cs_ref[...] = cs
        rs_ref[...] = rs

    return kernel


# --------------------------------- wrapper -----------------------------------
def reward_model_forward(input_ids, hidden_states, v_head_w,
                         pad_id=PAD_ID,
                         num_padding_at_beginning=NUM_PADDING_AT_BEGINNING):
    total_b, S = input_ids.shape
    assert total_b % 2 == 0
    bs = total_b // 2
    H = hidden_states.shape[-1]
    h_dtype = hidden_states.dtype
    itemsize = jnp.dtype(h_dtype).itemsize

    # --- kernel 1: rewards = v_head(hidden_states).squeeze(-1), lane-dense output ---
    tile_b = _pick_tile_b(total_b, S, H, itemsize)
    w_row = v_head_w.reshape(1, H).astype(jnp.float32)      # Linear(H,1,bias=False)
    rewards = pl.pallas_call(
        _v_head_kernel,
        out_shape=jax.ShapeDtypeStruct((total_b, S), jnp.float32),
        grid=(total_b // tile_b,),
        in_specs=[pl.BlockSpec((tile_b, S, H), lambda i: (i, 0, 0)),
                  pl.BlockSpec((1, H), lambda i: (0, 0))],
        out_specs=pl.BlockSpec((tile_b, S), lambda i: (i, 0)),
        compiler_params=pltpu.CompilerParams(
            dimension_semantics=("parallel",),
            vmem_limit_bytes=48 * 1024 * 1024),
        cost_estimate=pl.CostEstimate(
            flops=2 * total_b * S * H,
            transcendentals=0,
            bytes_accessed=total_b * S * H * itemsize + H * 4 + total_b * S * 4),
    )(hidden_states, w_row)

    ids_c = input_ids[:bs].astype(jnp.int32)
    ids_r = input_ids[bs:].astype(jnp.int32)
    rew_c = rewards[:bs]
    rew_r = rewards[bs:]

    # Pad the batch axis to a multiple of 8 sublanes; padded rows (all-PAD ids,
    # zero rewards) are masked out inside the kernel.
    bs_pad = -(-bs // 8) * 8
    if bs_pad != bs:
        pad = bs_pad - bs
        ids_c = jnp.pad(ids_c, ((0, pad), (0, 0)), constant_values=pad_id)
        ids_r = jnp.pad(ids_r, ((0, pad), (0, 0)), constant_values=pad_id)
        rew_c = jnp.pad(rew_c, ((0, pad), (0, 0)))
        rew_r = jnp.pad(rew_r, ((0, pad), (0, 0)))

    # --- kernel 2: pairwise loss + chosen/rejected end scores ---
    loss_kernel = _make_loss_kernel(bs, bs_pad, S, pad_id, num_padding_at_beginning)
    loss, cs, rs = pl.pallas_call(
        loss_kernel,
        out_shape=(jax.ShapeDtypeStruct((1, 1), jnp.float32),
                   jax.ShapeDtypeStruct((bs_pad, 1), jnp.float32),
                   jax.ShapeDtypeStruct((bs_pad, 1), jnp.float32)),
        grid=(1,),
        in_specs=[pl.BlockSpec((bs_pad, S), lambda i: (0, 0))] * 4,
        out_specs=(pl.BlockSpec((1, 1), lambda i: (0, 0)),
                   pl.BlockSpec((bs_pad, 1), lambda i: (0, 0)),
                   pl.BlockSpec((bs_pad, 1), lambda i: (0, 0))),
    )(ids_c, ids_r, rew_c, rew_r)

    return {
        "loss": loss[0, 0],
        "chosen_mean_scores": cs[:bs, 0],
        "rejected_mean_scores": rs[:bs, 0],
    }


# ------------------------------- demo / check --------------------------------
if __name__ == "__main__":
    key = jax.random.PRNGKey(0)
    bs, S, H, vocab = 2, 8, 32, 64

    # chosen (first bs rows) and rejected (last bs rows) share a prompt prefix.
    chosen_ids = jnp.array([[5, 6, 7, 8, 9, 3, PAD_ID, PAD_ID],
                            [11, 12, 13, 2, 5, PAD_ID, PAD_ID, PAD_ID]],
                           dtype=jnp.int32)
    rejected_ids = jnp.array([[5, 6, 7, 8, 2, 4, 1, PAD_ID],
                              [11, 12, 13, 9, PAD_ID, PAD_ID, PAD_ID, PAD_ID]],
                             dtype=jnp.int32)
    input_ids = jnp.concatenate([chosen_ids, rejected_ids], axis=0)   # (2*bs, S)

    k_emb, k_w1, k_vh = jax.random.split(key, 3)
    embed = jax.random.normal(k_emb, (vocab, H), jnp.float32) * 0.1
    w1 = jax.random.normal(k_w1, (H, H), jnp.float32) / jnp.sqrt(H)
    v_head_w = jax.random.normal(k_vh, (H, 1), jnp.float32) * 0.1  # Linear(H,1,bias=False).weight.T

    # TODO(synk): the HF base transformer (self.rwtranrsformer) is stubbed with a
    # deterministic embed -> linear -> tanh in plain JAX; only the RewardModel's own
    # compute (v_head + pairwise ranking loss) is implemented as Pallas kernels.
    hidden_states = jnp.tanh(embed[input_ids] @ w1)                  # (2*bs, S, H)

    out = reward_model_forward(input_ids, hidden_states, v_head_w)
    jax.block_until_ready(out)

    # -------- pure host-side reference (mirrors the PyTorch loop) --------
    rewards_ref = (np.asarray(hidden_states, np.float64)
                   @ np.asarray(v_head_w, np.float64))[..., 0]       # (2*bs, S)
    ids_np = np.asarray(input_ids)
    loss_ref = 0.0
    cms, rms = [], []
    for i in range(bs):
        cid, rid = ids_np[i], ids_np[bs + i]
        cr, rr = rewards_ref[i], rewards_ref[bs + i]
        c_pads = np.nonzero(cid == PAD_ID)[0]
        c_ind = int(c_pads[NUM_PADDING_AT_BEGINNING]) if len(c_pads) > NUM_PADDING_AT_BEGINNING else S
        div = np.nonzero(cid != rid)[0]
        if len(div) == 0:
            end_ind, divergence_ind, r_ind = S, S - 1, c_ind
        else:
            r_pads = np.nonzero(rid == PAD_ID)[0]
            r_ind = int(r_pads[NUM_PADDING_AT_BEGINNING]) if len(r_pads) > NUM_PADDING_AT_BEGINNING else S
            end_ind, divergence_ind = max(c_ind, r_ind), int(div[0])
        d = cr[divergence_ind:end_ind] - rr[divergence_ind:end_ind]
        logsig = np.minimum(d, 0.0) - np.log1p(np.exp(-np.abs(d)))
        loss_ref += -logsig.mean()
        cms.append(cr[c_ind - 1])
        rms.append(rr[r_ind - 1])
    loss_ref /= bs

    np.testing.assert_allclose(float(out["loss"]), loss_ref, rtol=2e-2, atol=2e-3)
    np.testing.assert_allclose(np.asarray(out["chosen_mean_scores"]),
                               np.array(cms), rtol=2e-2, atol=2e-3)
    np.testing.assert_allclose(np.asarray(out["rejected_mean_scores"]),
                               np.array(rms), rtol=2e-2, atol=2e-3)

    print("KERNEL_OK")
</pallas_src>

<mosaic_0001>
module attributes {stable_mosaic.version = 11 : i64} {
  func.func @_v_head_kernel(%arg0: i32, %arg1: memref<4x8x32xf32, #tpu.memory_space<vmem>>, %arg2: memref<1x32xf32, #tpu.memory_space<vmem>>, %arg3: memref<4x8xf32, #tpu.memory_space<vmem>>) attributes {dimension_semantics = [#tpu.dimension_semantics<parallel>], iteration_bounds = array<i64: 1>, scalar_prefetch = 0 : i64, scratch_operands = 0 : i64, tpu.core_type = #tpu.core_type<tc>, window_params = [{transform_indices = @transform_0, window_bounds = array<i64: 4, 8, 32>}, {pipeline_mode = #tpu.pipeline_mode<synchronous>, transform_indices = @transform_1, window_bounds = array<i64: 1, 32>}, {transform_indices = @transform_2, window_bounds = array<i64: 4, 8>}]} {
    %c0 = arith.constant 0 : index
    %c0_0 = arith.constant 0 : index
    %c0_1 = arith.constant 0 : index
    %0 = vector.load %arg1[%c0, %c0_0, %c0_1] : memref<4x8x32xf32, #tpu.memory_space<vmem>>, vector<4x8x32xf32>
    %c0_2 = arith.constant 0 : index
    %c0_3 = arith.constant 0 : index
    %1 = vector.load %arg2[%c0_2, %c0_3] : memref<1x32xf32, #tpu.memory_space<vmem>>, vector<1x32xf32>
    %2 = vector.shape_cast %1 : vector<1x32xf32> to vector<1x1x32xf32>
    %3 = vector.broadcast %2 : vector<1x1x32xf32> to vector<4x8x32xf32>
    %4 = arith.mulf %0, %3 : vector<4x8x32xf32>
    %cst = arith.constant dense<0.000000e+00> : vector<4x8xf32>
    %5 = vector.multi_reduction <add>, %4, %cst [2] : vector<4x8x32xf32> to vector<4x8xf32>
    %c0_4 = arith.constant 0 : index
    %c0_5 = arith.constant 0 : index
    %6 = vector.load %arg3[%c0_4, %c0_5] : memref<4x8xf32, #tpu.memory_space<vmem>>, vector<4x8xf32>
    tpu.vector_store %arg3[%c0_4, %c0_5], %5 {strides = array<i32>} : memref<4x8xf32, #tpu.memory_space<vmem>>, vector<4x8xf32>,
    return
  }
  func.func @transform_0(%arg0: i32) -> (i32, i32, i32) {
    %c0_i32 = arith.constant 0 : i32
    %c0_i32_0 = arith.constant 0 : i32
    %c0_i32_1 = arith.constant 0 : i32
    return %arg0, %c0_i32, %c0_i32_0 : i32, i32, i32
  }
  func.func @transform_1(%arg0: i32) -> (i32, i32) {
    %c0_i32 = arith.constant 0 : i32
    %c0_i32_0 = arith.constant 0 : i32
    %c0_i32_1 = arith.constant 0 : i32
    return %c0_i32, %c0_i32_0 : i32, i32
  }
  func.func @transform_2(%arg0: i32) -> (i32, i32) {
    %c0_i32 = arith.constant 0 : i32
    %c0_i32_0 = arith.constant 0 : i32
    return %arg0, %c0_i32 : i32, i32
  }
}

</mosaic_0001>

<bundles_post_ra>
// kernel: tpu_custom_call.1
= control target key start
LH: loop header
LB: loop body
LE: loop exit
PB: predicated region body
PF: predicated region fallthrough
CT: control target
= control target key end

     0   :  { %7 = vsyncpa [#allocation3], 0  ;;  %s199_s0 = inlined_call_operand.hbm [shape: f32[4,8,32], index: 0, kind: input, shape index: {}]   ;;  %s200_s1 = inlined_call_operand.vmem [shape: f32[1,32], index: 1, kind: input, shape index: {}]   ;;  %s201_s2 = inlined_call_operand.hbm [shape: f32[4,8], index: 2, kind: output, shape index: {}]  }
   0x1   :  { %8 = vsyncpa [#allocation4], 0  ;;  %s153_s9 = smov [#allocation2]   ;;  %s105_s13 = scalar_lea.hbm %s199_s0, 512 }
   0x2   :  { %s14_s10 = sshll.u32 %s153_s9, 4  ;;  %p106_p0 = scmp.ne.s32.totalorder %s199_s0, %s105_s13  ;;  %s15_s10 = int_to_ptr.vmem [resolvable:$true] %s14_s10 }
   0x3   :  { %p109_p1 = scmp.lt.u32.totalorder %s105_s13, %s199_s0 }
   0x5   :  { %p111_p2 = pnand %p109_p1, %p106_p0 }
   0x7   :  { %114 = shalt.err (!%p111_p2)
}
   0x8   :  { %s115_s18 = scalar_lea.vmem %s15_s10, 512  ;;  %p120_p4 = scmp.lt.s32.totalorder %s15_s10, %s15_s10 }
   0x9   :  { %p116_p3 = scmp.ne.s32.totalorder %s15_s10, %s115_s18  ;;  %p121_p5 = scmp.lt.s32.totalorder %s115_s18, %s115_s18 }
   0xb   :  { %p122_p6 = por %p121_p5, %p120_p4 }
   0xd   :  { %p123_p7 = pnand %p122_p6, %p116_p3 }
   0xf   :  { %126 = shalt.err (!%p123_p7)
}
  0x10   :  { %s154_s19 = smov 128   ;;  %s155_s20 = smov 8  }
  0x11   :  { %20 = dma.hbm_to_vmem [thread:$0]  %s199_s0, 512, %s15_s10, [#allocation3], %s154_s19, %s154_s19, %s155_s20  }
  0x12   :  { %149 = dma.done.wait [#allocation3], 512  }
  0x13   :  { %150 = vsyncadd [#allocation3], 4294966784  ;;  %v26_v0 = vld [vmem:[#allocation2] sm:$0xff]  ;;  %vm41_vm0 = vcmask 261120   ;;  %v28_v2 = vld [vmem:[#allocation2 + $0x10] sm:$0xff]  ;;  %v58_v13 = vlaneseq  ;;  %vm76_vm1 = vcmask 1041409  }
  0x14   :  { %v100_v1 = vld [vmem:[%s200_s1] ss:$0 sm:$0xff]  ;;  %v27_v5 = vld [vmem:[#allocation2 + $0x8] sm:$0xff]  ;;  %v29_v6 = vld [vmem:[#allocation2 + $0x18] sm:$0xff]  ;;  %vm78_vm2 = vcmask 1042434   ;;  %s156_s0 = smov [#allocation5]  }
  0x15   :  { %v37_v3 = vmul.f32 %v100_v1, %v26_v0  ;;  %v39_v4 = vmul.f32 %v100_v1, %v28_v2  ;;  %v38_v7 = vmul.f32 %v100_v1, %v27_v5  ;;  %v40_v8 = vmul.f32 %v100_v1, %v29_v6  ;;  %s91_s1 = sshll.u32 %s156_s0, 4  ;;  %s92_s1 = int_to_ptr.vmem [resolvable:$true] %s91_s1 }
  0x16   :  { %v59_v14 = vand.u32 127, %v58_v13  ;;  %v61_v15 = vshrl.u32 %v58_v13, 7  ;;  %vm80_vm3 = vcmask 1043459   ;;  %vm83_vm4 = vcmask 60416   ;;  %s127_s25 = scalar_lea.vmem %s92_s1, 64  ;;  %p132_p9 = scmp.lt.s32.totalorder %s92_s1, %s92_s1 }
  0x17   :  { %v42_v9 = vsel %vm41_vm0, %v37_v3, 0.0  ;;  %v48_v10 = vsel %vm41_vm0, %v39_v4, 0.0  ;;  %v45_v11 = vsel %vm41_vm0, %v38_v7, 0.0  ;;  %v51_v12 = vsel %vm41_vm0, %v40_v8, 0.0  ;;  %p128_p8 = scmp.ne.s32.totalorder %s92_s1, %s127_s25  ;;  %p133_p10 = scmp.lt.s32.totalorder %s127_s25, %s127_s25 }
  0x18   :  { %43 = vadd.xlane.f32.xlu0 %v42_v9  ;;  %49 = vadd.xlane.f32.xlu1 %v48_v10  ;;  %v62_v18 = vsub.s32 %v59_v14, %v61_v15 }
  0x19   :  { %p134_p11 = por %p133_p10, %p132_p9 }
  0x1b   :  { %p135_p12 = pnand %p134_p11, %p128_p8 }
  0x1c   :  { %46 = vadd.xlane.f32.xlu0 %v45_v11  ;;  %52 = vadd.xlane.f32.xlu1 %v51_v12 }
  0xa5   :  { %v44_v16 = vpop.xlane.xlu0 %43  ;;  %v50_v17 = vpop.xlane.xlu1 %49 }
  0xa6   :  { %v63_v21 = vrot.slane %v44_v16, %v62_v18  ;;  %v71_v24 = vrot.slane %v50_v17, %v62_v18 }
  0xa9   :  { %v47_v19 = vpop.xlane.xlu0 %46  ;;  %v53_v20 = vpop.xlane.xlu1 %52 }
  0xaa   :  { %v67_v22 = vrot.slane %v47_v19, %v62_v18  ;;  %v75_v23 = vrot.slane %v53_v20, %v62_v18 }
  0xac   :  { %v77_v25 = vsel %vm76_vm1, %v67_v22, %v63_v21 }
  0xad   :  { %v79_v26 = vsel %vm78_vm2, %v71_v24, %v77_v25 }
  0xae   :  { %v81_v27 = vsel %vm80_vm3, %v75_v23, %v79_v26 }
  0xaf   :  { %84 = vst.msk [vmem:[#allocation5] sm:$0xf] %vm83_vm4, %v81_v27 }
  0xb0   :  { %138 = shalt.err (!%p135_p12)
}
  0xb1   :  { %s139_s28 = scalar_lea.hbm %s201_s2, 64 }
  0xb2   :  { %p140_p13 = scmp.ne.s32.totalorder %s201_s2, %s139_s28  ;;  %p143_p0 = scmp.lt.u32.totalorder %s139_s28, %s201_s2 }
  0xb4   :  { %p145_p1 = pnand %p143_p0, %p140_p13 }
  0xb6   :  { %148 = shalt.err (!%p145_p1)
}
  0xb7   :  { %94 = dma.vmem_to_hbm [thread:$0]  %s92_s1, 64, %s201_s2, [#allocation4]  }
  0xb8   :  { %151 = dma.done.wait [#allocation4], 64  }
  0xb9   :  { %152 = vsyncadd [#allocation4], 4294967232 }
  0xba   :  { %98 = vsyncpa [#allocation3], 1 }
  0xbb   :  { %99 = vsyncpa [#allocation4], 1 }

</bundles_post_ra>
